<compile_context>
chip_gen: v7x
topology: tpu7x:2x2x1
jax: 0.10.0
libtpu: 0.0.40
codegen_flags: <defaults>
</compile_context>

<pallas_src>
import numpy as np
import jax
import jax.numpy as jnp
from jax import lax
from jax.experimental import pallas as pl
from jax.experimental.pallas import tpu as pltpu


# ----------------------------------------------------------------------------
# Host-side weight packing
# ----------------------------------------------------------------------------
def _build_up_matrices(wt, W):
    """ConvTranspose2d weight (Cin, Cup, s, s) -> (s, W*Cin, W*s*Cup) block-diag
    matrices mapping folded input rows to folded upsampled rows (per i)."""
    wt = np.asarray(wt, np.float32)
    cin, cup, s, _ = wt.shape
    U = np.zeros((s, W * cin, W * s * cup), np.float32)
    for i in range(s):
        # block[ci, j*cup + co] = wt[ci, co, i, j]
        blk = np.transpose(wt[:, :, i, :], (0, 2, 1)).reshape(cin, s * cup)
        for w in range(W):
            U[i, w * cin:(w + 1) * cin, w * s * cup:(w + 1) * s * cup] = blk
    return jnp.asarray(U)


def _build_band_matrices(w2, Wout):
    """Conv2d 3x3 weight (Cout, Cin, 3, 3) -> (3, Wout*Cin, Wout*Cout) banded
    matrices (one per ky); horizontal zero-padding is built into the band."""
    w2 = np.asarray(w2, np.float32)
    cout, cin, _, _ = w2.shape
    Wb = np.zeros((3, Wout * cin, Wout * cout), np.float32)
    for ky in range(3):
        for wo in range(Wout):
            for kx in range(3):
                wi = wo + kx - 1
                if 0 <= wi < Wout:
                    Wb[ky, wi * cin:(wi + 1) * cin,
                       wo * cout:(wo + 1) * cout] = w2[:, :, ky, kx].T
    return jnp.asarray(Wb)


# ----------------------------------------------------------------------------
# Pallas kernel
# ----------------------------------------------------------------------------
def _conv3x3_grouped(z, wb_ref, bc_ref, shift_ref, o_ref, s):
    """3x3 conv (pad=1) on the upsampled activation, stored as `s` row-groups
    z[i] = rows {i, i+s, ...} in folded (H, Ws*Cin) layout.  Output written in
    the same grouped, lane-dense layout."""
    # vertical halo rows (zero-padded image top/bottom) via shift-matrix matmuls
    z_dn = jnp.dot(shift_ref[0], z[s - 1], preferred_element_type=jnp.float32)
    z_up = jnp.dot(shift_ref[1], z[0], preferred_element_type=jnp.float32)
    bias = bc_ref[...]
    for i in range(s):
        top = z[i - 1] if i > 0 else z_dn          # upsampled row r-1
        mid = z[i]                                  # upsampled row r
        bot = z[i + 1] if i < s - 1 else z_up       # upsampled row r+1
        acc = (jnp.dot(top, wb_ref[0], preferred_element_type=jnp.float32)
               + jnp.dot(mid, wb_ref[1], preferred_element_type=jnp.float32)
               + jnp.dot(bot, wb_ref[2], preferred_element_type=jnp.float32))
        o_ref[0, i] = acc + bias


def _make_kernel(s):
    if s > 1:
        def kernel(x_ref, u_ref, bup_ref, wb_ref, bc_ref, shift_ref, o_ref):
            x = x_ref[0]                                       # (H, W*Cin)
            z = [jnp.dot(x, u_ref[i], preferred_element_type=jnp.float32)
                 + bup_ref[...] for i in range(s)]             # (H, Ws*Cin) each
            _conv3x3_grouped(z, wb_ref, bc_ref, shift_ref, o_ref, s)
        return kernel

    def kernel(x_ref, wb_ref, bc_ref, shift_ref, o_ref):       # up is None
        _conv3x3_grouped([x_ref[0]], wb_ref, bc_ref, shift_ref, o_ref, 1)
    return kernel


# ----------------------------------------------------------------------------
# Wrapper (NCHW in / NCHW out, like the PyTorch module)
# ----------------------------------------------------------------------------
def recov_block_pallas(x_nchw, params):
    """params: wt (Cin,Cin,s,s) or None, bt (Cin,) or None, w2 (Cout,Cin,3,3), b2 (Cout,)."""
    N, Cin, H, W = x_nchw.shape
    w2, b2 = params['w2'], params['b2']
    Cout = w2.shape[0]
    wt = params.get('wt')
    s = 1 if wt is None else wt.shape[2]
    Hs, Ws = H * s, W * s

    # fold NCHW -> (N, H, W*Cin), channels-last inside each folded column group
    xf = jnp.transpose(x_nchw, (0, 2, 3, 1)).reshape(N, H, W * Cin).astype(jnp.float32)

    wband = _build_band_matrices(w2, Ws)                              # (3, Ws*Cin, Ws*Cout)
    bconv = jnp.tile(jnp.asarray(b2, jnp.float32), Ws).reshape(1, Ws * Cout)
    shift = jnp.asarray(np.stack([np.eye(H, k=-1), np.eye(H, k=1)]).astype(np.float32))

    x_spec = pl.BlockSpec((1, H, W * Cin), lambda n: (n, 0, 0))
    out_spec = pl.BlockSpec((1, s, H, Ws * Cout), lambda n: (n, 0, 0, 0))
    full = lambda a: pl.BlockSpec(a.shape, lambda n, _nd=a.ndim: (0,) * _nd)

    if s > 1:
        U = _build_up_matrices(wt, W)                                 # (s, W*Cin, Ws*Cin)
        bup = jnp.tile(jnp.asarray(params['bt'], jnp.float32), Ws).reshape(1, Ws * Cin)
        args = (xf, U, bup, wband, bconv, shift)
        in_specs = [x_spec, full(U), full(bup), full(wband), full(bconv), full(shift)]
    else:
        args = (xf, wband, bconv, shift)
        in_specs = [x_spec, full(wband), full(bconv), full(shift)]

    out_g = pl.pallas_call(
        _make_kernel(s),
        out_shape=jax.ShapeDtypeStruct((N, s, H, Ws * Cout), jnp.float32),
        grid=(N,),
        in_specs=in_specs,
        out_specs=out_spec,
        compiler_params=pltpu.CompilerParams(dimension_semantics=("parallel",)),
    )(*args)

    # un-group rows and unfold: (N, s, H, Ws*Cout) -> NCHW (N, Cout, Hs, Ws)
    o = out_g.reshape(N, s, H, Ws, Cout)
    o = jnp.transpose(o, (0, 2, 1, 3, 4)).reshape(N, Hs, Ws, Cout)
    return jnp.transpose(o, (0, 3, 1, 2))


# ----------------------------------------------------------------------------
# Pure-JAX reference matching the PyTorch forward
# ----------------------------------------------------------------------------
def recov_block_ref(x, params):
    wt = params.get('wt')
    if wt is not None:                      # ConvTranspose2d, kernel=stride=s
        s = wt.shape[2]
        up = jnp.einsum('nchw,cdij->ndhiwj', x, wt)
        N, d, H, _, W, _ = up.shape
        x = up.reshape(N, d, H * s, W * s) + params['bt'][None, :, None, None]
    y = lax.conv_general_dilated(x, params['w2'], (1, 1), ((1, 1), (1, 1)),
                                 dimension_numbers=('NCHW', 'OIHW', 'NCHW'))
    return y + params['b2'][None, :, None, None]


if __name__ == "__main__":
    key = jax.random.PRNGKey(0)
    kx, k1, k2, k3, k4, k5, k6 = jax.random.split(key, 7)

    N, Cin, Cout, H, W, s = 2, 4, 8, 16, 16, 2
    x = jax.random.normal(kx, (N, Cin, H, W), jnp.float32)   # NCHW, like PyTorch

    # scale_factor = 2: ConvTranspose2d(Cin, Cin, k=2, stride=2) + Conv2d 3x3 pad 1
    params_up = dict(
        wt=jax.random.normal(k1, (Cin, Cin, s, s), jnp.float32) * 0.3,
        bt=jax.random.normal(k2, (Cin,), jnp.float32) * 0.1,
        w2=jax.random.normal(k3, (Cout, Cin, 3, 3), jnp.float32) * 0.2,
        b2=jax.random.normal(k4, (Cout,), jnp.float32) * 0.1,
    )
    out = jax.block_until_ready(recov_block_pallas(x, params_up))
    assert out.shape == (N, Cout, H * s, W * s), out.shape
    err = float(jnp.max(jnp.abs(out - recov_block_ref(x, params_up))))
    if err > 2e-3:
        raise AssertionError(f"upsample+conv mismatch: max abs err {err}")

    # scale_factor = 1: up is None, only the 3x3 recov conv
    params_noup = dict(
        wt=None, bt=None,
        w2=jax.random.normal(k5, (Cout, Cin, 3, 3), jnp.float32) * 0.2,
        b2=jax.random.normal(k6, (Cout,), jnp.float32) * 0.1,
    )
    out1 = jax.block_until_ready(recov_block_pallas(x, params_noup))
    assert out1.shape == (N, Cout, H, W), out1.shape
    err1 = float(jnp.max(jnp.abs(out1 - recov_block_ref(x, params_noup))))
    if err1 > 2e-3:
        raise AssertionError(f"conv-only mismatch: max abs err {err1}")

    print("KERNEL_OK")
</pallas_src>

<mosaic_0001>
module attributes {stable_mosaic.version = 11 : i64} {
  func.func @kernel(%arg0: i32, %arg1: memref<1x16x64xf32, #tpu.memory_space<vmem>>, %arg2: memref<2x64x128xf32, #tpu.memory_space<vmem>>, %arg3: memref<1x128xf32, #tpu.memory_space<vmem>>, %arg4: memref<3x128x256xf32, #tpu.memory_space<vmem>>, %arg5: memref<1x256xf32, #tpu.memory_space<vmem>>, %arg6: memref<2x16x16xf32, #tpu.memory_space<vmem>>, %arg7: memref<1x2x16x256xf32, #tpu.memory_space<vmem>>) attributes {dimension_semantics = [#tpu.dimension_semantics<parallel>], iteration_bounds = array<i64: 2>, scalar_prefetch = 0 : i64, scratch_operands = 0 : i64, tpu.core_type = #tpu.core_type<tc>, window_params = [{transform_indices = @transform_0, window_bounds = array<i64: 1, 16, 64>}, {pipeline_mode = #tpu.pipeline_mode<synchronous>, transform_indices = @transform_1, window_bounds = array<i64: 2, 64, 128>}, {pipeline_mode = #tpu.pipeline_mode<synchronous>, transform_indices = @transform_2, window_bounds = array<i64: 1, 128>}, {pipeline_mode = #tpu.pipeline_mode<synchronous>, transform_indices = @transform_3, window_bounds = array<i64: 3, 128, 256>}, {pipeline_mode = #tpu.pipeline_mode<synchronous>, transform_indices = @transform_4, window_bounds = array<i64: 1, 256>}, {pipeline_mode = #tpu.pipeline_mode<synchronous>, transform_indices = @transform_5, window_bounds = array<i64: 2, 16, 16>}, {transform_indices = @transform_6, window_bounds = array<i64: 1, 2, 16, 256>}]} {
    %c0 = arith.constant 0 : index
    %c0_0 = arith.constant 0 : index
    %c0_1 = arith.constant 0 : index
    %0 = vector.load %arg1[%c0, %c0_0, %c0_1] : memref<1x16x64xf32, #tpu.memory_space<vmem>>, vector<1x16x64xf32>
    %1 = vector.shape_cast %0 : vector<1x16x64xf32> to vector<16x64xf32>
    %c0_2 = arith.constant 0 : index
    %c0_3 = arith.constant 0 : index
    %c0_4 = arith.constant 0 : index
    %2 = vector.load %arg2[%c0_2, %c0_3, %c0_4] : memref<2x64x128xf32, #tpu.memory_space<vmem>>, vector<1x64x128xf32>
    %3 = vector.shape_cast %2 : vector<1x64x128xf32> to vector<64x128xf32>
    %cst = arith.constant dense<0.000000e+00> : vector<16x128xf32>
    %4 = tpu.matmul %1, %3, %cst {dimension_numbers = #tpu.dot_dimension_numbers<[1], [0], [0], [1], [0, 0, 1, 1], [], []>} : vector<16x64xf32>, vector<64x128xf32>, vector<16x128xf32> -> vector<16x128xf32>
    %c0_5 = arith.constant 0 : index
    %c0_6 = arith.constant 0 : index
    %5 = vector.load %arg3[%c0_5, %c0_6] : memref<1x128xf32, #tpu.memory_space<vmem>>, vector<1x128xf32>
    %6 = vector.broadcast %5 : vector<1x128xf32> to vector<16x128xf32>
    %7 = arith.addf %4, %6 : vector<16x128xf32>
    %c1 = arith.constant 1 : index
    %c0_7 = arith.constant 0 : index
    %c0_8 = arith.constant 0 : index
    %8 = vector.load %arg2[%c1, %c0_7, %c0_8] : memref<2x64x128xf32, #tpu.memory_space<vmem>>, vector<1x64x128xf32>
    %9 = vector.shape_cast %8 : vector<1x64x128xf32> to vector<64x128xf32>
    %cst_9 = arith.constant dense<0.000000e+00> : vector<16x128xf32>
    %10 = tpu.matmul %1, %9, %cst_9 {dimension_numbers = #tpu.dot_dimension_numbers<[1], [0], [0], [1], [0, 0, 1, 1], [], []>} : vector<16x64xf32>, vector<64x128xf32>, vector<16x128xf32> -> vector<16x128xf32>
    %c0_10 = arith.constant 0 : index
    %c0_11 = arith.constant 0 : index
    %11 = vector.load %arg3[%c0_10, %c0_11] : memref<1x128xf32, #tpu.memory_space<vmem>>, vector<1x128xf32>
    %12 = vector.broadcast %11 : vector<1x128xf32> to vector<16x128xf32>
    %13 = arith.addf %10, %12 : vector<16x128xf32>
    %c0_12 = arith.constant 0 : index
    %c0_13 = arith.constant 0 : index
    %c0_14 = arith.constant 0 : index
    %14 = vector.load %arg6[%c0_12, %c0_13, %c0_14] : memref<2x16x16xf32, #tpu.memory_space<vmem>>, vector<1x16x16xf32>
    %15 = vector.shape_cast %14 : vector<1x16x16xf32> to vector<16x16xf32>
    %cst_15 = arith.constant dense<0.000000e+00> : vector<16x128xf32>
    %16 = tpu.matmul %15, %13, %cst_15 {dimension_numbers = #tpu.dot_dimension_numbers<[1], [0], [0], [1], [0, 0, 1, 1], [], []>} : vector<16x16xf32>, vector<16x128xf32>, vector<16x128xf32> -> vector<16x128xf32>
    %c1_16 = arith.constant 1 : index
    %c0_17 = arith.constant 0 : index
    %c0_18 = arith.constant 0 : index
    %17 = vector.load %arg6[%c1_16, %c0_17, %c0_18] : memref<2x16x16xf32, #tpu.memory_space<vmem>>, vector<1x16x16xf32>
    %18 = vector.shape_cast %17 : vector<1x16x16xf32> to vector<16x16xf32>
    %cst_19 = arith.constant dense<0.000000e+00> : vector<16x128xf32>
    %19 = tpu.matmul %18, %7, %cst_19 {dimension_numbers = #tpu.dot_dimension_numbers<[1], [0], [0], [1], [0, 0, 1, 1], [], []>} : vector<16x16xf32>, vector<16x128xf32>, vector<16x128xf32> -> vector<16x128xf32>
    %c0_20 = arith.constant 0 : index
    %c0_21 = arith.constant 0 : index
    %20 = vector.load %arg5[%c0_20, %c0_21] : memref<1x256xf32, #tpu.memory_space<vmem>>, vector<1x256xf32>
    %c0_22 = arith.constant 0 : index
    %c0_23 = arith.constant 0 : index
    %c0_24 = arith.constant 0 : index
    %21 = vector.load %arg4[%c0_22, %c0_23, %c0_24] : memref<3x128x256xf32, #tpu.memory_space<vmem>>, vector<1x128x256xf32>
    %22 = vector.shape_cast %21 : vector<1x128x256xf32> to vector<128x256xf32>
    %cst_25 = arith.constant dense<0.000000e+00> : vector<16x256xf32>
    %23 = tpu.matmul %16, %22, %cst_25 {dimension_numbers = #tpu.dot_dimension_numbers<[1], [0], [0], [1], [0, 0, 1, 1], [], []>} : vector<16x128xf32>, vector<128x256xf32>, vector<16x256xf32> -> vector<16x256xf32>
    %c1_26 = arith.constant 1 : index
    %c0_27 = arith.constant 0 : index
    %c0_28 = arith.constant 0 : index
    %24 = vector.load %arg4[%c1_26, %c0_27, %c0_28] : memref<3x128x256xf32, #tpu.memory_space<vmem>>, vector<1x128x256xf32>
    %25 = vector.shape_cast %24 : vector<1x128x256xf32> to vector<128x256xf32>
    %cst_29 = arith.constant dense<0.000000e+00> : vector<16x256xf32>
    %26 = tpu.matmul %7, %25, %cst_29 {dimension_numbers = #tpu.dot_dimension_numbers<[1], [0], [0], [1], [0, 0, 1, 1], [], []>} : vector<16x128xf32>, vector<128x256xf32>, vector<16x256xf32> -> vector<16x256xf32>
    %27 = arith.addf %23, %26 : vector<16x256xf32>
    %c2 = arith.constant 2 : index
    %c0_30 = arith.constant 0 : index
    %c0_31 = arith.constant 0 : index
    %28 = vector.load %arg4[%c2, %c0_30, %c0_31] : memref<3x128x256xf32, #tpu.memory_space<vmem>>, vector<1x128x256xf32>
    %29 = vector.shape_cast %28 : vector<1x128x256xf32> to vector<128x256xf32>
    %cst_32 = arith.constant dense<0.000000e+00> : vector<16x256xf32>
    %30 = tpu.matmul %13, %29, %cst_32 {dimension_numbers = #tpu.dot_dimension_numbers<[1], [0], [0], [1], [0, 0, 1, 1], [], []>} : vector<16x128xf32>, vector<128x256xf32>, vector<16x256xf32> -> vector<16x256xf32>
    %31 = arith.addf %27, %30 : vector<16x256xf32>
    %32 = vector.broadcast %20 : vector<1x256xf32> to vector<16x256xf32>
    %33 = arith.addf %31, %32 : vector<16x256xf32>
    %c0_33 = arith.constant 0 : index
    %c0_34 = arith.constant 0 : index
    %c0_35 = arith.constant 0 : index
    %c0_36 = arith.constant 0 : index
    %34 = vector.load %arg7[%c0_33, %c0_34, %c0_35, %c0_36] : memref<1x2x16x256xf32, #tpu.memory_space<vmem>>, vector<1x1x16x256xf32>
    %35 = vector.shape_cast %34 : vector<1x1x16x256xf32> to vector<16x256xf32>
    %36 = vector.shape_cast %33 : vector<16x256xf32> to vector<1x1x16x256xf32>
    tpu.vector_store %arg7[%c0_33, %c0_34, %c0_35, %c0_36], %36 {strides = array<i32>} : memref<1x2x16x256xf32, #tpu.memory_space<vmem>>, vector<1x1x16x256xf32>,
    %c0_37 = arith.constant 0 : index
    %c0_38 = arith.constant 0 : index
    %c0_39 = arith.constant 0 : index
    %37 = vector.load %arg4[%c0_37, %c0_38, %c0_39] : memref<3x128x256xf32, #tpu.memory_space<vmem>>, vector<1x128x256xf32>
    %38 = vector.shape_cast %37 : vector<1x128x256xf32> to vector<128x256xf32>
    %cst_40 = arith.constant dense<0.000000e+00> : vector<16x256xf32>
    %39 = tpu.matmul %7, %38, %cst_40 {dimension_numbers = #tpu.dot_dimension_numbers<[1], [0], [0], [1], [0, 0, 1, 1], [], []>} : vector<16x128xf32>, vector<128x256xf32>, vector<16x256xf32> -> vector<16x256xf32>
    %c1_41 = arith.constant 1 : index
    %c0_42 = arith.constant 0 : index
    %c0_43 = arith.constant 0 : index
    %40 = vector.load %arg4[%c1_41, %c0_42, %c0_43] : memref<3x128x256xf32, #tpu.memory_space<vmem>>, vector<1x128x256xf32>
    %41 = vector.shape_cast %40 : vector<1x128x256xf32> to vector<128x256xf32>
    %cst_44 = arith.constant dense<0.000000e+00> : vector<16x256xf32>
    %42 = tpu.matmul %13, %41, %cst_44 {dimension_numbers = #tpu.dot_dimension_numbers<[1], [0], [0], [1], [0, 0, 1, 1], [], []>} : vector<16x128xf32>, vector<128x256xf32>, vector<16x256xf32> -> vector<16x256xf32>
    %43 = arith.addf %39, %42 : vector<16x256xf32>
    %c2_45 = arith.constant 2 : index
    %c0_46 = arith.constant 0 : index
    %c0_47 = arith.constant 0 : index
    %44 = vector.load %arg4[%c2_45, %c0_46, %c0_47] : memref<3x128x256xf32, #tpu.memory_space<vmem>>, vector<1x128x256xf32>
    %45 = vector.shape_cast %44 : vector<1x128x256xf32> to vector<128x256xf32>
    %cst_48 = arith.constant dense<0.000000e+00> : vector<16x256xf32>
    %46 = tpu.matmul %19, %45, %cst_48 {dimension_numbers = #tpu.dot_dimension_numbers<[1], [0], [0], [1], [0, 0, 1, 1], [], []>} : vector<16x128xf32>, vector<128x256xf32>, vector<16x256xf32> -> vector<16x256xf32>
    %47 = arith.addf %43, %46 : vector<16x256xf32>
    %48 = vector.broadcast %20 : vector<1x256xf32> to vector<16x256xf32>
    %49 = arith.addf %47, %48 : vector<16x256xf32>
    %c0_49 = arith.constant 0 : index
    %c1_50 = arith.constant 1 : index
    %c0_51 = arith.constant 0 : index
    %c0_52 = arith.constant 0 : index
    %50 = vector.load %arg7[%c0_49, %c1_50, %c0_51, %c0_52] : memref<1x2x16x256xf32, #tpu.memory_space<vmem>>, vector<1x1x16x256xf32>
    %51 = vector.shape_cast %50 : vector<1x1x16x256xf32> to vector<16x256xf32>
    %52 = vector.shape_cast %49 : vector<16x256xf32> to vector<1x1x16x256xf32>
    tpu.vector_store %arg7[%c0_49, %c1_50, %c0_51, %c0_52], %52 {strides = array<i32>} : memref<1x2x16x256xf32, #tpu.memory_space<vmem>>, vector<1x1x16x256xf32>,
    return
  }
  func.func @transform_0(%arg0: i32) -> (i32, i32, i32) {
    %c0_i32 = arith.constant 0 : i32
    %c0_i32_0 = arith.constant 0 : i32
    %c0_i32_1 = arith.constant 0 : i32
    return %arg0, %c0_i32, %c0_i32_0 : i32, i32, i32
  }
  func.func @transform_1(%arg0: i32) -> (i32, i32, i32) {
    %c0_i32 = arith.constant 0 : i32
    %c0_i32_0 = arith.constant 0 : i32
    %c0_i32_1 = arith.constant 0 : i32
    %c0_i32_2 = arith.constant 0 : i32
    return %c0_i32, %c0_i32_0, %c0_i32_1 : i32, i32, i32
  }
  func.func @transform_2(%arg0: i32) -> (i32, i32) {
    %c0_i32 = arith.constant 0 : i32
    %c0_i32_0 = arith.constant 0 : i32
    %c0_i32_1 = arith.constant 0 : i32
    return %c0_i32, %c0_i32_0 : i32, i32
  }
  func.func @transform_3(%arg0: i32) -> (i32, i32, i32) {
    %c0_i32 = arith.constant 0 : i32
    %c0_i32_0 = arith.constant 0 : i32
    %c0_i32_1 = arith.constant 0 : i32
    %c0_i32_2 = arith.constant 0 : i32
    return %c0_i32, %c0_i32_0, %c0_i32_1 : i32, i32, i32
  }
  func.func @transform_4(%arg0: i32) -> (i32, i32) {
    %c0_i32 = arith.constant 0 : i32
    %c0_i32_0 = arith.constant 0 : i32
    %c0_i32_1 = arith.constant 0 : i32
    return %c0_i32, %c0_i32_0 : i32, i32
  }
  func.func @transform_5(%arg0: i32) -> (i32, i32, i32) {
    %c0_i32 = arith.constant 0 : i32
    %c0_i32_0 = arith.constant 0 : i32
    %c0_i32_1 = arith.constant 0 : i32
    %c0_i32_2 = arith.constant 0 : i32
    return %c0_i32, %c0_i32_0, %c0_i32_1 : i32, i32, i32
  }
  func.func @transform_6(%arg0: i32) -> (i32, i32, i32, i32) {
    %c0_i32 = arith.constant 0 : i32
    %c0_i32_0 = arith.constant 0 : i32
    %c0_i32_1 = arith.constant 0 : i32
    %c0_i32_2 = arith.constant 0 : i32
    return %arg0, %c0_i32, %c0_i32_0, %c0_i32_1 : i32, i32, i32, i32
  }
}

</mosaic_0001>

<bundles_post_ra>
// kernel: tpu_custom_call.1
= control target key start
LH: loop header
LB: loop body
LE: loop exit
PB: predicated region body
PF: predicated region fallthrough
CT: control target
= control target key end

     0   :  { %s2482_s0 = inlined_call_operand.hbm [shape: f32[2,16,64], index: 0, kind: input, shape index: {}]   ;;  %s2483_s1 = inlined_call_operand.hbm [shape: f32[2,64,128], index: 1, kind: input, shape index: {}]   ;;  %s2484_s2 = inlined_call_operand.vmem [shape: f32[1,128], index: 2, kind: input, shape index: {}]   ;;  %s2485_s3 = inlined_call_operand.hbm [shape: f32[3,128,256], index: 3, kind: input, shape index: {}]   ;;  %s2486_s4 = inlined_call_operand.vmem [shape: f32[1,256], index: 4, kind: input, shape index: {}]   ;;  %s2487_s5 = inlined_call_operand.hbm [shape: f32[2,16,16], index: 5, kind: input, shape index: {}]   ;;  %s2488_s6 = inlined_call_operand.hbm [shape: f32[2,2,16,256], index: 6, kind: output, shape index: {}]  }
   0x1   :  { %2496 = sst [smem:[#allocation15_spill]] %s2483_s1 }
   0x2   :  { %11 = vsyncpa [#allocation3], 0 }
   0x3   :  { %13 = vsyncpa [#allocation3 + $0x1], 0 }
   0x4   :  { %14 = vsyncpa [#allocation6], 0 }
   0x5   :  { %15 = vsyncpa [#allocation9], 0 }
   0x6   :  { %16 = vsyncpa [#allocation4], 0 }
   0x7   :  { %18 = vsyncpa [#allocation4 + $0x1], 0  ;;  %s2158_s21 = smov 0   ;;  %s2160_s22 = smov 0  }
   0x8   :  { %s2162_s23 = smov 0   ;;  %s2164_s24 = smov 0  }
   0x9 LB: > { %s2179_s25 = sadd.s32 4294967295, %s2109_s24   ;;  %s1474_s26 = sadd.s32 4294967294, %s2109_s24   ;;  %s2109_s24 = sphi %s2164_s24, %s2519_s24   ;;  %s2105_s23 = sphi %s2162_s23, %s2518_s23   ;;  %s2101_s22 = sphi %s2160_s22, %s2517_s22   ;;  %s2097_s21 = sphi %s2158_s21, %s2516_s21  }
   0xa   : > { %p44_p0 = scmp.ne.s32.totalorder %s2101_s22, %s2097_s21  ;;  %p2489_p1 = scmp.eq.s32.totalorder %s2179_s25, 0 }
   0xb   : > { %p179_p3 = scmp.eq.s32.totalorder %s1474_s26, 1  ;;  %p1475_p5 = scmp.ge.s32.totalorder %s2109_s24, 1 }
   0xc   : > { %p2188_p4 = por %p2489_p1, %p44_p0  ;;  %p186_p7 = scmp.lt.s32.totalorder %s2109_s24, 3 }
   0xd   : > { %p2193_p6 = por %p179_p3, %p44_p0  ;;  %s2111_s30 = smov [#allocation5]  }
   0xe   : > { %s2497_s27 = scalar_select %p2188_p4, 1, 0 }
   0xf   : > { %s2498_s28 = scalar_select %p2193_p6, 1, 0 }
  0x10   : > { %p2198_p8 = pnand %p1475_p5, %p186_p7  ;;  %s198_s7 = sshll.u32 %s2111_s30, 4  ;;  %s2202_s7 = int_to_ptr.vmem [resolvable:$true] %s198_s7 }
  0x11   : > { %s2112_s9 = smov [#allocation7]   ;;  %s2501_s1 = sld [smem:[#allocation15_spill]] }
  0x12   : > { %s2499_s29 = scalar_select %p2198_p8, 1, 0 }
  0x13   : > { %p1853_p9 = pneg %p2198_p8  ;;  %s214_s10 = sshll.u32 %s2112_s9, 4  ;;  %s2213_s10 = int_to_ptr.vmem [resolvable:$true] %s214_s10 }
  0x15   : > { %p2209_p11 = pnand %p1853_p9, %p2489_p1 }
  0x17   : > { %s1921_s13 = scalar_lea.hbm %s2501_s1, 2048  ;;  %p2223_p13 = pneg %p2209_p11 }
  0x18   : > { %p1922_p12 = scmp.ne.s32.totalorder %s2501_s1, %s1921_s13  ;;  %p1928_p5 = scmp.lt.u32.totalorder %s1921_s13, %s2501_s1 }
  0x1a   : > { %p1924_p0 = pnand %p2223_p13, %p1922_p12 }
  0x1c   : > { %p1925_p3 = pneg %p1924_p0 }
  0x1e   : > { %p1930_p7 = pnand %p1928_p5, %p1925_p3 }
  0x20   : > { %1933 = shalt.err (!%p1930_p7)
}
  0x21   : > { %s1934_s19 = scalar_lea.vmem %s2202_s7, 2048  ;;  %p1942_p2 = scmp.lt.s32.totalorder %s2202_s7, %s2202_s7 }
  0x22   : > { %p1935_p9 = scmp.ne.s32.totalorder %s2202_s7, %s1934_s19  ;;  %p1943_p6 = scmp.lt.s32.totalorder %s1934_s19, %s1934_s19 }
  0x24   : > { %p1937_p10 = pnand %p1935_p9, %p2223_p13  ;;  %p1944_p12 = por %p1943_p6, %p1942_p2 }
  0x26   : > { %p1938_p1 = pneg %p1937_p10 }
  0x28   : > { %p1945_p0 = pnand %p1944_p12, %p1938_p1 }
  0x2a   : > { %1948 = shalt.err (!%p1945_p0)
}
  0x2b   : > { %s2490_s20 = smov 128   ;;  %s2492_s26 = smov 8  }
  0x2c   : > { %1856 = dma.hbm_to_vmem [thread:$0]  (!%p2209_p11), %s2501_s1, 2048, %s2202_s7, [#allocation6], %s2490_s20, %s2490_s20, %s2492_s26  }
  0x2d   : > { %s1949_s13 = scalar_lea.hbm %s2485_s3, 12288 }
  0x2e   : > { %p1950_p1 = scmp.ne.s32.totalorder %s2485_s3, %s1949_s13  ;;  %p1956_p10 = scmp.lt.u32.totalorder %s1949_s13, %s2485_s3 }
  0x30   : > { %p1952_p2 = pnand %p1950_p1, %p2223_p13 }
  0x32   : > { %p1953_p6 = pneg %p1952_p2 }
  0x34   : > { %p1958_p3 = pnand %p1956_p10, %p1953_p6 }
  0x36   : > { %1961 = shalt.err (!%p1958_p3)
}
  0x37   : > { %s1962_s7 = scalar_lea.vmem %s2213_s10, 12288  ;;  %p1970_p12 = scmp.lt.s32.totalorder %s2213_s10, %s2213_s10 }
  0x38   : > { %p1963_p5 = scmp.ne.s32.totalorder %s2213_s10, %s1962_s7  ;;  %p1971_p0 = scmp.lt.s32.totalorder %s1962_s7, %s1962_s7 }
  0x3a   : > { %p1965_p7 = pnand %p1963_p5, %p2223_p13  ;;  %p1972_p1 = por %p1971_p0, %p1970_p12 }
  0x3c   : > { %p1966_p9 = pneg %p1965_p7 }
  0x3e   : > { %p1973_p2 = pnand %p1972_p1, %p1966_p9 }
  0x40   : > { %1976 = shalt.err (!%p1973_p2)
}
  0x41   : > { %s2115_s19 = smov 256   ;;  %s2116_s30 = smov 16  }
  0x42   : > { %1859 = dma.hbm_to_vmem [thread:$0]  (!%p2209_p11), %s2485_s3, 12288, %s2213_s10, [#allocation6], %s2115_s19, %s2115_s19, %s2116_s30  }
  0x43   : > { %s2117_s12 = smov [#allocation8]   ;;  %s2271_s14 = sadd.s32 1, %s2109_s24  }
  0x44   : > { %s230_s13 = sshll.u32 %s2117_s12, 4  ;;  %s1977_s18 = scalar_lea.hbm %s2487_s5, 512  ;;  %s231_s13 = int_to_ptr.vmem [resolvable:$true] %s230_s13 }
  0x45   : > { %p1978_p6 = scmp.ne.s32.totalorder %s2487_s5, %s1977_s18  ;;  %p1984_p5 = scmp.lt.u32.totalorder %s1977_s18, %s2487_s5 }
  0x47   : > { %p1980_p10 = pnand %p1978_p6, %p2223_p13 }
  0x49   : > { %p1981_p3 = pneg %p1980_p10 }
  0x4b   : > { %p1986_p7 = pnand %p1984_p5, %p1981_p3 }
  0x4d   : > { %1989 = shalt.err (!%p1986_p7)
}
  0x4e   : > { %s1990_s10 = scalar_lea.vmem %s231_s13, 512  ;;  %p1998_p1 = scmp.lt.s32.totalorder %s231_s13, %s231_s13 }
  0x4f   : > { %p1991_p9 = scmp.ne.s32.totalorder %s231_s13, %s1990_s10  ;;  %p1999_p2 = scmp.lt.s32.totalorder %s1990_s10, %s1990_s10 }
  0x51   : > { %p1993_p12 = pnand %p1991_p9, %p2223_p13  ;;  %p2000_p4 = por %p1999_p2, %p1998_p1 }
  0x53   : > { %p1994_p0 = pneg %p1993_p12 }
  0x55   : > { %p2001_p8 = pnand %p2000_p4, %p1994_p0 }
  0x57   : > { %2004 = shalt.err (!%p2001_p8)
}
  0x58   : > { %s2503_s20 = smov 8   ;;  %s2504_s19 = smov 128  }
  0x59   : > { %1862 = dma.hbm_to_vmem [thread:$0]  (!%p2209_p11), %s2487_s5, 512, %s231_s13, [#allocation9], %s2504_s19, %s2504_s19, %s2503_s20  }
  0x5a   : > { %s28_s16 = ssub.s32 %s2109_s24, %s2271_s14  ;;  %s31_s8 = sadd.s32 1, %s2105_s23 }
  0x5b   : > { %p29_p4 = scmp.eq.s32.totalorder %s28_s16, 0  ;;  %p38_p8 = scmp.ne.s32.totalorder %s2105_s23, %s2101_s22 }
  0x5c   : > { %p39_p13 = scmp.eq.s32.totalorder %s2109_s24, 0  ;;  %p1874_p6 = scmp.lt.s32.totalorder %s2109_s24, 2 }
  0x5d   : > { %s2302_s30 = scalar_select %p29_p4, %s2105_s23, %s31_s8  }
  0x5e   : > { %p40_p10 = por %p39_p13, %p38_p8  ;;  %p2505_p3 = scmp.eq.s32.totalorder %s2179_s25, 1 }
  0x5f   : > { %s244_s11 = sand.u32 1, %s2105_s23   ;;  %s1507_s12 = sshll.u32 %s2109_s24, 8 }
  0x60   : > { %p2306_p5 = por %p2505_p3, %p38_p8  ;;  %s1480_s15 = sshll.u32 %s244_s11, 4 }
  0x61   : > { %s2315_s13 = scalar_lea.hbm %s2482_s0, %s1507_s12  ;;  %s248_s7 = scalar_lea.vmem [#allocation2], %s1480_s15 }
  0x62   : > { %s255_s10 = sshll.u32 %s248_s7, 4  ;;  %p2317_p11 = pnand %p1874_p6, %p40_p10  ;;  %s2321_s10 = int_to_ptr.vmem [resolvable:$true] %s255_s10 }
  0x63   : > { %s2323_s26 = scalar_lea.sflag [#allocation3], %s244_s11  ;;  %s2005_s16 = scalar_lea.hbm %s2315_s13, 256 }
  0x64   : > { %p2006_p7 = scmp.ne.s32.totalorder %s2315_s13, %s2005_s16  ;;  %p2007_p9 = pneg %p2317_p11 }
  0x65   : > { %s2010_s15 = scalar_lea.hbm %s2482_s0, 512  ;;  %p2011_p1 = scmp.lt.u32.totalorder %s2315_s13, %s2482_s0 }
  0x66   : > { %p2008_p12 = pnand %p2007_p9, %p2006_p7  ;;  %p2012_p2 = scmp.lt.u32.totalorder %s2010_s15, %s2005_s16 }
  0x67   : > { %p2014_p8 = scmp.lt.u32.totalorder %s2005_s16, %s2315_s13 }
  0x68   : > { %p2009_p0 = pneg %p2008_p12  ;;  %p2013_p4 = por %p2012_p2, %p2011_p1 }
  0x6a   : > { %p2015_p13 = por %p2014_p8, %p2013_p4 }
  0x6c   : > { %p2016_p6 = pnand %p2015_p13, %p2009_p0 }
  0x6e   : > { %2019 = shalt.err (!%p2016_p6)
}
  0x6f   : > { %s2020_s11 = scalar_lea.vmem %s2321_s10, 256  ;;  %s2118_s7 = smov [#allocation2]  }
  0x70   : > { %p2021_p10 = scmp.ne.s32.totalorder %s2321_s10, %s2020_s11  ;;  %s2025_s8 = sshll.u32 %s2118_s7, 4  ;;  %s2026_s8 = int_to_ptr.vmem [resolvable:$false] %s2025_s8 }
  0x71   : > { %s2027_s12 = scalar_lea.vmem %s2026_s8, 512  ;;  %p2028_p12 = scmp.lt.s32.totalorder %s2321_s10, %s2026_s8 }
  0x72   : > { %p2023_p3 = pnand %p2021_p10, %p2007_p9  ;;  %p2029_p1 = scmp.lt.s32.totalorder %s2027_s12, %s2020_s11 }
  0x74   : > { %p2024_p7 = pneg %p2023_p3  ;;  %p2030_p2 = por %p2029_p1, %p2028_p12 }
  0x76   : > { %p2031_p4 = pnand %p2030_p2, %p2024_p7 }
  0x78   : > { %2034 = shalt.err (!%p2031_p4)
}
  0x79   : > { %1866 = dma.hbm_to_vmem [thread:$0]  (!%p2317_p11), %s2315_s13, 256, %s2321_s10, %s2323_s26, %s2504_s19, %s2504_s19, %s2503_s20  }
  0x7a   : > { %p2508_p9 = scmp.ne.s32.totalorder %s2499_s29, 0 }
  0x7b   : > { %s2357_s16 = sand.u32 (!%p2508_p9), 1, %s2101_s22   ;;  %p2509_p0 = scmp.ne.s32.totalorder (!%p2508_p9), %s2497_s27, 0 }
  0x7c   : > { %267 = sbr.rel (%p2508_p9) target bundleno = 859 (0x35b), region = 44  ;;  %s1484_s15 = sshll.u32 (!%p2508_p9), %s2357_s16, 4 }
  0x7d   : > { %s270_s17 = scalar_lea.sflag (!%p2508_p9), [#allocation3], %s2357_s16  ;;  %s2361_s18 = scalar_lea.vmem (!%p2508_p9), [#allocation2], %s1484_s15 }
  0x83   : > { %2080 = dma.done.wait (%p2509_p0), %s270_s17, 256  }
  0x84   : > { %2082 = vsyncadd (%p2509_p0), %s270_s17, 4294967040  ;;  %p2510_p11 = scmp.eq.s32.totalorder %s2179_s25, 0 }
  0x86   : > { %2084 = dma.done.wait (%p2510_p11), [#allocation6], 14336   ;;  %p2511_p8 = pmov %p2510_p11 }
  0x88   : > { %2086 = vsyncadd (%p2511_p8), [#allocation6], 4294952960  ;;  %p2512_p13 = pmov %p2511_p8 }
  0x89   : > { %p2513_p6 = pmov %p2511_p8 }
  0x8a   : > { %2088 = dma.done.wait (%p2512_p13), [#allocation9], 512  }
  0x8b   : > { %2090 = vsyncadd (%p2513_p6), [#allocation9], 4294966784  ;;  %v316_v0 = vld [vmem:[#allocation5] sm:$0xff]  ;;  %v317_v1 = vld [vmem:[#allocation5 + $0x8] sm:$0xff]  ;;  %vm331_vm0 = vcmask 523264   ;;  %vm499_vm1 = vcmask 130048  }
  0x8c   : > { %v414_v2 = vld [vmem:[#allocation5 + $0x40] sm:$0xff]  ;;  %v1589_v3 = vpack.c.bf16 %v317_v1, %v316_v0  ;;  %v415_v4 = vld [vmem:[#allocation5 + $0x48] sm:$0xff]  ;;  %v318_v5 = vld [vmem:[#allocation5 + $0x10] sm:$0xff]  ;;  %v2119_v60 = vmov 0.0   ;;  %s1488_s13 = sshll.u32 %s2357_s16, 6  ;;  %s1508_s26 = sshll.u32 %s2179_s25, 10 }
  0x8d   : > { %v319_v6 = vld [vmem:[#allocation5 + $0x18] sm:$0xff]  ;;  %v1605_v7 = vpack.c.bf16 %v415_v4, %v414_v2  ;;  %v416_v9 = vld [vmem:[#allocation5 + $0x50] sm:$0xff]  ;;  %v320_v11 = vld [vmem:[#allocation5 + $0x20] sm:$0xff]  ;;  %s313_s10 = scalar_lea.vmem [#allocation10], %s1488_s13  ;;  %s2438_s8 = scalar_lea.hbm %s2488_s6, %s1508_s26 }
  0x8e   : > { %v1593_v8 = vpack.c.bf16 %v319_v6, %v318_v5  ;;  %v417_v10 = vld [vmem:[#allocation5 + $0x58] sm:$0xff]  ;;  %1590 = vmatprep.subr.bf16.mxu0 %v1589_v3  ;;  %v321_v13 = vld [vmem:[#allocation5 + $0x28] sm:$0xff]  ;;  %v418_v14 = vld [vmem:[#allocation5 + $0x60] sm:$0xff]  ;;  %s1372_s1 = sshll.u32 %s313_s10, 4  ;;  %s1359_s12 = scalar_lea.sflag [#allocation4], %s2357_s16  ;;  %s2433_s1 = int_to_ptr.vmem [resolvable:$true] %s1372_s1 }
  0x8f   : > { %v1609_v12 = vpack.c.bf16 %v417_v10, %v416_v9  ;;  %v419_v15 = vld [vmem:[#allocation5 + $0x68] sm:$0xff]  ;;  %1606 = vmatprep.subr.bf16.mxu1 %v1605_v7  ;;  %1592 = vmatpush3.bf16.msra.mxu0 %v1589_v3  ;;  %v1597_v16 = vpack.c.bf16 %v321_v13, %v320_v11  ;;  %v314_v17 = vld [vmem:[%s2361_s18] sm:$0xff]  ;;  %v323_v20 = vld [vmem:[#allocation5 + $0x38] sm:$0xff]  ;;  %s2035_s25 = scalar_lea.vmem %s2433_s1, 1024  ;;  %s2120_s15 = smov [#allocation10]  }
  0x90   : > { %1608 = vmatpush3.bf16.msra.mxu1 %v1605_v7  ;;  %1594 = vmatprep.subr.bf16.mxu0 %v1593_v8  ;;  %v1613_v18 = vpack.c.bf16 %v419_v15, %v418_v14  ;;  %v322_v19 = vld [vmem:[#allocation5 + $0x30] sm:$0xff]  ;;  %v421_v22 = vld [vmem:[#allocation5 + $0x78] sm:$0xff]  ;;  %v497_v26 = vld [vmem:[#allocation8] sm:$0xff]  ;;  %p2036_p10 = scmp.ne.s32.totalorder %s2433_s1, %s2035_s25  ;;  %s2039_s17 = sshll.u32 %s2120_s15, 4  ;;  %s2040_s17 = int_to_ptr.vmem [resolvable:$false] %s2039_s17 }
  0x91   : > { %1610 = vmatprep.subr.bf16.mxu1 %v1609_v12  ;;  %1553 = vmatprep.mubr.msk.f32.mxu0 %vm331_vm0, %v314_v17  ;;  %v420_v21 = vld [vmem:[#allocation5 + $0x70] sm:$0xff]  ;;  %v1601_v23 = vpack.c.bf16 %v323_v20, %v322_v19  ;;  %v315_v25 = vld [vmem:[%s2361_s18 + $0x8] sm:$0xff]  ;;  %v1489_v28 = vld [vmem:[%s2484_s2] ss:$0 sm:$0xff]  ;;  %s2041_s18 = scalar_lea.vmem %s2040_s17, 2048  ;;  %p2042_p12 = scmp.lt.s32.totalorder %s2433_s1, %s2040_s17 }
  0x92   : > { %1572 = vmatprep.mubr.msk.f32.mxu1 %vm331_vm0, %v314_v17  ;;  %v1617_v24 = vpack.c.bf16 %v421_v22, %v420_v21  ;;  %v582_v27 = vld [vmem:[#allocation8 + $0x10] sm:$0xff]  ;;  %v700_v33 = vld [vmem:[#allocation7 + $0x108] sm:$0xff]  ;;  %v702_v34 = vld [vmem:[#allocation7 + $0x118] sm:$0xff]  ;;  %p2037_p3 = pnand %p2036_p10, %p2306_p5  ;;  %p2043_p1 = scmp.lt.s32.totalorder %s2041_s18, %s2035_s25 }
  0x93   : > { %1596 = vmatpush3.bf16.msra.mxu0 %v1593_v8  ;;  %v1629_v40 = vpack.c.bf16 %v702_v34, %v700_v33  ;;  %v699_v41 = vld [vmem:[#allocation7 + $0x100] sm:$0xff]  ;;  %v701_v42 = vld [vmem:[#allocation7 + $0x110] sm:$0xff]  ;;  %v704_v44 = vld [vmem:[#allocation7 + $0x128] sm:$0xff] }
  0x94   : > { %1612 = vmatpush3.bf16.msra.mxu1 %v1609_v12  ;;  %1598 = vmatprep.subr.bf16.mxu0 %v1597_v16  ;;  %v706_v45 = vld [vmem:[#allocation7 + $0x138] sm:$0xff]  ;;  %v1631_v47 = vpack.c.bf16 %v701_v42, %v699_v41  ;;  %v498_v48 = vld [vmem:[#allocation8 + $0x8] sm:$0xff]  ;;  %v703_v50 = vld [vmem:[#allocation7 + $0x120] sm:$0xff]  ;;  %p2038_p7 = pneg %p2037_p3  ;;  %p2044_p2 = por %p2043_p1, %p2042_p12 }
  0x95   : > { %1614 = vmatprep.subr.bf16.mxu1 %v1613_v18  ;;  %v583_v46 = vld [vmem:[#allocation8 + $0x18] sm:$0xff]  ;;  %v1633_v49 = vpack.c.bf16 %v706_v45, %v704_v44  ;;  %v705_v51 = vld [vmem:[#allocation7 + $0x130] sm:$0xff]  ;;  %v708_v52 = vld [vmem:[#allocation7 + $0x148] sm:$0xff] }
  0x96   : > { %v710_v53 = vld [vmem:[#allocation7 + $0x158] sm:$0xff]  ;;  %v1635_v54 = vpack.c.bf16 %v705_v51, %v703_v50  ;;  %v707_v56 = vld [vmem:[#allocation7 + $0x140] sm:$0xff]  ;;  %v709_v57 = vld [vmem:[#allocation7 + $0x150] sm:$0xff]  ;;  %p2045_p4 = pnand %p2044_p2, %p2038_p7 }
  0x97   : > { %1600 = vmatpush3.bf16.msra.mxu0 %v1597_v16  ;;  %v1637_v55 = vpack.c.bf16 %v710_v53, %v708_v52  ;;  %v712_v58 = vld [vmem:[#allocation7 + $0x168] sm:$0xff]  ;;  %v714_v59 = vld [vmem:[#allocation7 + $0x178] sm:$0xff]  ;;  %v1639_v61 = vpack.c.bf16 %v709_v57, %v707_v56  ;;  %v711_v63 = vld [vmem:[#allocation7 + $0x160] sm:$0xff] }
  0x98   : > { %1616 = vmatpush3.bf16.msra.mxu1 %v1613_v18  ;;  %1602 = vmatprep.subr.bf16.mxu0 %v1601_v23  ;;  %v1641_v62 = vpack.c.bf16 %v714_v59, %v712_v58  ;;  %v713_v0 = vld [vmem:[#allocation7 + $0x170] sm:$0xff]  ;;  %v716_v1 = vld [vmem:[#allocation7 + $0x188] sm:$0xff]  ;;  %v718_v2 = vld [vmem:[#allocation7 + $0x198] sm:$0xff] }
  0x99   : > { %1618 = vmatprep.subr.bf16.mxu1 %v1617_v24  ;;  %v1643_v3 = vpack.c.bf16 %v713_v0, %v711_v63  ;;  %v1645_v4 = vpack.c.bf16 %v718_v2, %v716_v1  ;;  %v715_v5 = vld [vmem:[#allocation7 + $0x180] sm:$0xff]  ;;  %v717_v6 = vld [vmem:[#allocation7 + $0x190] sm:$0xff]  ;;  %v720_v7 = vld [vmem:[#allocation7 + $0x1a8] sm:$0xff] }
  0x9a   : > { %v722_v8 = vld [vmem:[#allocation7 + $0x1b8] sm:$0xff]  ;;  %v1647_v9 = vpack.c.bf16 %v717_v6, %v715_v5  ;;  %v719_v11 = vld [vmem:[#allocation7 + $0x1a0] sm:$0xff]  ;;  %v721_v12 = vld [vmem:[#allocation7 + $0x1b0] sm:$0xff] }
  0x9b   : > { %1604 = vmatpush3.bf16.msra.mxu0 %v1601_v23  ;;  %v1649_v10 = vpack.c.bf16 %v722_v8, %v720_v7  ;;  %v724_v13 = vld [vmem:[#allocation7 + $0x1c8] sm:$0xff]  ;;  %v726_v14 = vld [vmem:[#allocation7 + $0x1d8] sm:$0xff]  ;;  %v1651_v15 = vpack.c.bf16 %v721_v12, %v719_v11  ;;  %v723_v17 = vld [vmem:[#allocation7 + $0x1c0] sm:$0xff] }
  0x9c   : > { %1620 = vmatpush3.bf16.msra.mxu1 %v1617_v24  ;;  %v1653_v16 = vpack.c.bf16 %v726_v14, %v724_v13  ;;  %v725_v18 = vld [vmem:[#allocation7 + $0x1d0] sm:$0xff]  ;;  %v728_v19 = vld [vmem:[#allocation7 + $0x1e8] sm:$0xff]  ;;  %v730_v20 = vld [vmem:[#allocation7 + $0x1f8] sm:$0xff] }
  0x9d   : > { %v1655_v21 = vpack.c.bf16 %v725_v18, %v723_v17  ;;  %v1657_v22 = vpack.c.bf16 %v730_v20, %v728_v19  ;;  %v727_v23 = vld [vmem:[#allocation7 + $0x1e0] sm:$0xff]  ;;  %v729_v24 = vld [vmem:[#allocation7 + $0x1f0] sm:$0xff]  ;;  %v1025_v33 = vld [vmem:[#allocation7 + $0x38] sm:$0xff] }
  0x9e   : > { %1554 = vmatmul.mubr.msk.f32.vlgmr.msra.gmra.mrb[0].mxu0 %vm331_vm0, %v315_v25  ;;  %v1027_v41 = vld [vmem:[#allocation7 + $0x48] sm:$0xff]  ;;  %v1029_v42 = vld [vmem:[#allocation7 + $0x58] sm:$0xff]  ;;  %v1026_v45 = vld [vmem:[#allocation7 + $0x40] sm:$0xff] }
  0x9f   : > { %1573 = vmatmul.mubr.msk.f32.vlgmr.msra.gmra.mrb[0].mxu1 %vm331_vm0, %v315_v25  ;;  %1579 = vmatprep.mubr.msk.f32.mxu0 %vm499_vm1, %v497_v26  ;;  %v1019_v25 = vld [vmem:[#allocation7 + $0x8] sm:$0xff]  ;;  %v1021_v26 = vld [vmem:[#allocation7 + $0x18] sm:$0xff]  ;;  %v1765_v44 = vpack.c.bf16 %v1029_v42, %v1027_v41  ;;  %v1030_v51 = vld [vmem:[#allocation7 + $0x60] sm:$0xff] }
  0xa0   : > { %1586 = vmatprep.mubr.msk.f32.mxu1 %vm499_vm1, %v582_v27  ;;  %v1659_v27 = vpack.c.bf16 %v729_v24, %v727_v23  ;;  %v1032_v52 = vld [vmem:[#allocation7 + $0x70] sm:$0xff]  ;;  %v1035_v53 = vld [vmem:[#allocation7 + $0x88] sm:$0xff]  ;;  %v1034_v57 = vld [vmem:[#allocation7 + $0x80] sm:$0xff] }
  0xa1   : > { %v1036_v58 = vld [vmem:[#allocation7 + $0x90] sm:$0xff]  ;;  %v1039_v59 = vld [vmem:[#allocation7 + $0xa8] sm:$0xff]  ;;  %v1038_v0 = vld [vmem:[#allocation7 + $0xa0] sm:$0xff] }
  0xa2   : > { %v1040_v1 = vld [vmem:[#allocation7 + $0xb0] sm:$0xff]  ;;  %v1043_v2 = vld [vmem:[#allocation7 + $0xc8] sm:$0xff]  ;;  %v1042_v6 = vld [vmem:[#allocation7 + $0xc0] sm:$0xff] }
  0xa3   : > { %v1044_v7 = vld [vmem:[#allocation7 + $0xd0] sm:$0xff]  ;;  %v1047_v8 = vld [vmem:[#allocation7 + $0xe8] sm:$0xff]  ;;  %v1046_v12 = vld [vmem:[#allocation7 + $0xe0] sm:$0xff] }
  0xa4   : > { %v1048_v13 = vld [vmem:[#allocation7 + $0xf0] sm:$0xff]  ;;  %v1237_v14 = vld [vmem:[#allocation7 + $0x208] sm:$0xff]  ;;  %v1236_v18 = vld [vmem:[#allocation7 + $0x200] sm:$0xff] }
  0xa5   : > { %v1238_v19 = vld [vmem:[#allocation7 + $0x210] sm:$0xff]  ;;  %v1241_v20 = vld [vmem:[#allocation7 + $0x228] sm:$0xff]  ;;  %v1240_v24 = vld [vmem:[#allocation7 + $0x220] sm:$0xff] }
  0xa6   : > { %v1253_v41 = vld [vmem:[#allocation7 + $0x288] sm:$0xff]  ;;  %v1255_v42 = vld [vmem:[#allocation7 + $0x298] sm:$0xff] }
 0x171   : > { %v1555_v29 = vpop.f32.mrb[0].mxu0 }
 0x172   : > { %v2386_v30 = vadd.f32 %v1555_v29, %v1489_v28  ;;  %v1574_v31 = vpop.f32.mrb[0].mxu1  ;;  %v404_v32 = vpop.f32.mrb[1].mxu0  ;;  %v1018_v29 = vld [vmem:[#allocation7] sm:$0xff] }
 0x173   : > { %v2388_v35 = vadd.f32 %v1574_v31, %v1489_v28  ;;  %v2390_v36 = vadd.f32 %v1489_v28, %v404_v32  ;;  %v488_v37 = vpop.f32.mrb[1].mxu1  ;;  %v1020_v31 = vld [vmem:[#allocation7 + $0x10] sm:$0xff]  ;;  %v1023_v32 = vld [vmem:[#allocation7 + $0x28] sm:$0xff] }
 0x174   : > { %v2392_v38 = vadd.f32 %v1489_v28, %v488_v37  ;;  %v1757_v28 = vpack.c.bf16 %v1021_v26, %v1019_v25  ;;  %v1759_v34 = vpack.c.bf16 %v1020_v31, %v1018_v29  ;;  %v1022_v37 = vld [vmem:[#allocation7 + $0x20] sm:$0xff]  ;;  %v1242_v25 = vld [vmem:[#allocation7 + $0x230] sm:$0xff]  ;;  %v1245_v26 = vld [vmem:[#allocation7 + $0x248] sm:$0xff] }
 0x175   : > { %v1625_v39 = vpack.c.bf16 %v2386_v30, %v2390_v36  ;;  %v1244_v31 = vld [vmem:[#allocation7 + $0x240] sm:$0xff] }
 0x176   : > { %v1621_v43 = vpack.c.bf16 %v2388_v35, %v2392_v38 }
 0x177   : > { %1626 = vmatprep.subr.bf16.mxu1 %v1625_v39 }
 0x178   : > { %1622 = vmatprep.subr.bf16.mxu0 %v1621_v43  ;;  %1628 = vmatpush3.bf16.msra.mxu1 %v1625_v39  ;;  %v1024_v39 = vld [vmem:[#allocation7 + $0x30] sm:$0xff] }
 0x179   : > { %1624 = vmatpush3.bf16.msra.mxu0 %v1621_v43  ;;  %1726 = vmatprep.subr.bf16.mxu1 %v1629_v40  ;;  %v1763_v43 = vpack.c.bf16 %v1024_v39, %v1022_v37  ;;  %v1248_v39 = vld [vmem:[#allocation7 + $0x260] sm:$0xff] }
 0x17a   : > { %1630 = vmatprep.subr.bf16.mxu0 %v1629_v40  ;;  %v1761_v40 = vpack.c.bf16 %v1025_v33, %v1023_v32  ;;  %v1246_v32 = vld [vmem:[#allocation7 + $0x250] sm:$0xff]  ;;  %v1249_v33 = vld [vmem:[#allocation7 + $0x268] sm:$0xff] }
 0x17b   : > { %1587 = vmatmul.mubr.msk.f32.vlgmr.msra.gmra.mrb[2].mxu1 %vm499_vm1, %v583_v46  ;;  %v1028_v46 = vld [vmem:[#allocation7 + $0x50] sm:$0xff]  ;;  %v1799_v37 = vpack.c.bf16 %v1246_v32, %v1244_v31 }
 0x17c   : > { %1580 = vmatmul.mubr.msk.f32.vlgmr.msra.gmra.mrb[2].mxu0 %vm499_vm1, %v498_v48  ;;  %1728 = vmatpush1.bf16.msra.mxu1 %v1631_v47  ;;  %v1033_v48 = vld [vmem:[#allocation7 + $0x78] sm:$0xff] }
 0x17d   : > { %1632 = vmatpush1.bf16.msra.mxu0 %v1631_v47  ;;  %1730 = vmatprep.subr.bf16.mxu1 %v1633_v49  ;;  %v1031_v47 = vld [vmem:[#allocation7 + $0x68] sm:$0xff] }
 0x17e   : > { %1634 = vmatprep.subr.bf16.mxu0 %v1633_v49  ;;  %795 = vmatprep.mubr.f32.mxu0 %v2119_v60  ;;  %v1767_v49 = vpack.c.bf16 %v1028_v46, %v1026_v45  ;;  %v1769_v50 = vpack.c.bf16 %v1033_v48, %v1031_v47  ;;  %v1252_v45 = vld [vmem:[#allocation7 + $0x280] sm:$0xff]  ;;  %v1254_v46 = vld [vmem:[#allocation7 + $0x290] sm:$0xff]  ;;  %v1257_v47 = vld [vmem:[#allocation7 + $0x2a8] sm:$0xff] }
 0x17f   : > { %1146 = vmatprep.mubr.f32.mxu1 %v2119_v60  ;;  %v1259_v48 = vld [vmem:[#allocation7 + $0x2b8] sm:$0xff] }
 0x180   : > { %1732 = vmatpush1.bf16.msra.mxu1 %v1635_v54 }
 0x181   : > { %1636 = vmatpush1.bf16.msra.mxu0 %v1635_v54  ;;  %1734 = vmatprep.subr.bf16.mxu1 %v1637_v55  ;;  %v1037_v54 = vld [vmem:[#allocation7 + $0x98] sm:$0xff] }
 0x182   : > { %1638 = vmatprep.subr.bf16.mxu0 %v1637_v55  ;;  %v1771_v55 = vpack.c.bf16 %v1032_v52, %v1030_v51  ;;  %v1773_v56 = vpack.c.bf16 %v1037_v54, %v1035_v53  ;;  %v1258_v51 = vld [vmem:[#allocation7 + $0x2b0] sm:$0xff]  ;;  %v1261_v52 = vld [vmem:[#allocation7 + $0x2c8] sm:$0xff]  ;;  %v1263_v53 = vld [vmem:[#allocation7 + $0x2d8] sm:$0xff] }
 0x184   : > { %1736 = vmatpush1.bf16.msra.mxu1 %v1639_v61 }
 0x185   : > { %1640 = vmatpush1.bf16.msra.mxu0 %v1639_v61  ;;  %1738 = vmatprep.subr.bf16.mxu1 %v1641_v62  ;;  %v1041_v61 = vld [vmem:[#allocation7 + $0xb8] sm:$0xff] }
 0x186   : > { %1642 = vmatprep.subr.bf16.mxu0 %v1641_v62  ;;  %v1775_v62 = vpack.c.bf16 %v1036_v58, %v1034_v57  ;;  %v1777_v63 = vpack.c.bf16 %v1041_v61, %v1039_v59  ;;  %v1262_v57 = vld [vmem:[#allocation7 + $0x2d0] sm:$0xff]  ;;  %v1265_v58 = vld [vmem:[#allocation7 + $0x2e8] sm:$0xff]  ;;  %v1267_v59 = vld [vmem:[#allocation7 + $0x2f8] sm:$0xff] }
 0x188   : > { %1740 = vmatpush1.bf16.msra.mxu1 %v1643_v3 }
 0x189   : > { %1644 = vmatpush1.bf16.msra.mxu0 %v1643_v3  ;;  %1742 = vmatprep.subr.bf16.mxu1 %v1645_v4  ;;  %v1045_v3 = vld [vmem:[#allocation7 + $0xd8] sm:$0xff] }
 0x18a   : > { %1646 = vmatprep.subr.bf16.mxu0 %v1645_v4  ;;  %v1779_v4 = vpack.c.bf16 %v1040_v1, %v1038_v0  ;;  %v1781_v5 = vpack.c.bf16 %v1045_v3, %v1043_v2  ;;  %v1266_v0 = vld [vmem:[#allocation7 + $0x2f0] sm:$0xff] }
 0x18c   : > { %1744 = vmatpush1.bf16.msra.mxu1 %v1647_v9 }
 0x18d   : > { %1648 = vmatpush1.bf16.msra.mxu0 %v1647_v9  ;;  %1746 = vmatprep.subr.bf16.mxu1 %v1649_v10  ;;  %v1049_v9 = vld [vmem:[#allocation7 + $0xf8] sm:$0xff] }
 0x18e   : > { %1650 = vmatprep.subr.bf16.mxu0 %v1649_v10  ;;  %v1783_v10 = vpack.c.bf16 %v1044_v7, %v1042_v6  ;;  %v1785_v11 = vpack.c.bf16 %v1049_v9, %v1047_v8  ;;  %v1000_v6 = vlaneseq  ;;  %v665_v9 = vld [vmem:[%s2486_s4] sm:$0x3] }
 0x190   : > { %1748 = vmatpush1.bf16.msra.mxu1 %v1651_v15  ;;  %v1001_v7 = vshrl.u32 %v1000_v6, 7 }
 0x191   : > { %1652 = vmatpush1.bf16.msra.mxu0 %v1651_v15  ;;  %1750 = vmatprep.subr.bf16.mxu1 %v1653_v16  ;;  %v1239_v15 = vld [vmem:[#allocation7 + $0x218] sm:$0xff] }
 0x192   : > { %1654 = vmatprep.subr.bf16.mxu0 %v1653_v16  ;;  %v1787_v16 = vpack.c.bf16 %v1048_v13, %v1046_v12  ;;  %v1789_v17 = vpack.c.bf16 %v1239_v15, %v1237_v14  ;;  %v1002_v8 = vsub.s32 0, %v1001_v7 }
 0x194   : > { %1752 = vmatpush1.bf16.msra.mxu1 %v1655_v21 }
 0x195   : > { %1656 = vmatpush1.bf16.msra.mxu0 %v1655_v21  ;;  %1754 = vmatprep.subr.bf16.mxu1 %v1657_v22  ;;  %v1243_v21 = vld [vmem:[#allocation7 + $0x238] sm:$0xff] }
 0x196   : > { %1658 = vmatprep.subr.bf16.mxu0 %v1657_v22  ;;  %v2410_v22 = vpack.c.bf16 %v1238_v19, %v1236_v18  ;;  %v2412_v23 = vpack.c.bf16 %v1243_v21, %v1241_v20 }
 0x198   : > { %1756 = vmatpush1.bf16.msra.mxu1 %v1659_v27 }
 0x199   : > { %1660 = vmatpush1.bf16.msra.mxu0 %v1659_v27  ;;  %1758 = vmatprep.subr.bf16.mxu1 %v1757_v28  ;;  %v1247_v27 = vld [vmem:[#allocation7 + $0x258] sm:$0xff] }
 0x19a   : > { %1662 = vmatprep.subr.bf16.mxu0 %v1757_v28  ;;  %v1795_v28 = vpack.c.bf16 %v1242_v25, %v1240_v24  ;;  %v1797_v29 = vpack.c.bf16 %v1247_v27, %v1245_v26 }
 0x19b   : > { %1147 = vmatmul.mubr.f32.vlgmr.msra.gmra.mrb[4].mxu1 %v2392_v38 }
 0x19c   : > { %796 = vmatmul.mubr.f32.vlgmr.msra.gmra.mrb[4].mxu0 %v2390_v36  ;;  %1760 = vmatpush1.bf16.msra.mxu1 %v1759_v34 }
 0x19d   : > { %801 = vmatprep.mubr.f32.mxu0 %v2119_v60  ;;  %1152 = vmatprep.mubr.f32.mxu1 %v2119_v60 }
 0x19e   : > { %1762 = vmatprep.subr.bf16.mxu1 %v1761_v40  ;;  %1664 = vmatpush1.bf16.msra.mxu0 %v1759_v34  ;;  %v1251_v34 = vld [vmem:[#allocation7 + $0x278] sm:$0xff] }
 0x19f   : > { %1153 = vmatmul.mubr.f32.gmra.mrb[6].mxu1 %v2388_v35  ;;  %1666 = vmatprep.subr.bf16.mxu0 %v1761_v40  ;;  %v1250_v40 = vld [vmem:[#allocation7 + $0x270] sm:$0xff] }
 0x1a0   : > { %802 = vmatmul.mubr.f32.gmra.mrb[6].mxu0 %v2386_v30  ;;  %1764 = vmatpush1.bf16.msra.mxu1 %v1763_v43 }
 0x1a1   : > { %1766 = vmatprep.subr.bf16.mxu1 %v1765_v44  ;;  %1223 = vmatprep.mubr.f32.mxu1 %v2119_v60 }
 0x1a2   : > { %1668 = vmatpush1.bf16.msra.mxu0 %v1763_v43  ;;  %872 = vmatprep.mubr.f32.mxu0 %v2119_v60  ;;  %v1803_v43 = vpack.c.bf16 %v1250_v40, %v1248_v39 }
 0x1a3   : > { %1670 = vmatprep.subr.bf16.mxu0 %v1765_v44  ;;  %v1805_v44 = vpack.c.bf16 %v1255_v42, %v1253_v41 }
 0x1a4   : > { %1768 = vmatpush1.bf16.msra.mxu1 %v1767_v49 }
 0x1a5   : > { %1770 = vmatprep.subr.bf16.mxu1 %v1769_v50 }
 0x1a6   : > { %1672 = vmatpush1.bf16.msra.mxu0 %v1767_v49  ;;  %v1809_v49 = vpack.c.bf16 %v1259_v48, %v1257_v47 }
 0x1a7   : > { %1674 = vmatprep.subr.bf16.mxu0 %v1769_v50  ;;  %v1256_v50 = vld [vmem:[#allocation7 + $0x2a0] sm:$0xff] }
 0x1a8   : > { %1772 = vmatpush1.bf16.msra.mxu1 %v1771_v55  ;;  %v1811_v54 = vpack.c.bf16 %v1258_v51, %v1256_v50 }
 0x1a9   : > { %1774 = vmatprep.subr.bf16.mxu1 %v1773_v56 }
 0x1aa   : > { %1676 = vmatpush1.bf16.msra.mxu0 %v1771_v55  ;;  %v1813_v55 = vpack.c.bf16 %v1263_v53, %v1261_v52 }
 0x1ab   : > { %1678 = vmatprep.subr.bf16.mxu0 %v1773_v56  ;;  %v1260_v56 = vld [vmem:[#allocation7 + $0x2c0] sm:$0xff] }
 0x1ac   : > { %1776 = vmatpush1.bf16.msra.mxu1 %v1775_v62  ;;  %v1815_v61 = vpack.c.bf16 %v1262_v57, %v1260_v56 }
 0x1ad   : > { %1778 = vmatprep.subr.bf16.mxu1 %v1777_v63 }
 0x1ae   : > { %1680 = vmatpush1.bf16.msra.mxu0 %v1775_v62  ;;  %v1817_v62 = vpack.c.bf16 %v1267_v59, %v1265_v58 }
 0x1af   : > { %1682 = vmatprep.subr.bf16.mxu0 %v1777_v63  ;;  %v1264_v63 = vld [vmem:[#allocation7 + $0x2e0] sm:$0xff] }
 0x1b0   : > { %1780 = vmatpush1.bf16.msra.mxu1 %v1779_v4  ;;  %v1819_v1 = vpack.c.bf16 %v1266_v0, %v1264_v63 }
 0x1b1   : > { %1782 = vmatprep.subr.bf16.mxu1 %v1781_v5 }
 0x1b2   : > { %1684 = vmatpush1.bf16.msra.mxu0 %v1779_v4 }
 0x1b3   : > { %1686 = vmatprep.subr.bf16.mxu0 %v1781_v5 }
 0x1b4   : > { %1784 = vmatpush1.bf16.msra.mxu1 %v1783_v10 }
 0x1b5   : > { %1786 = vmatprep.subr.bf16.mxu1 %v1785_v11 }
 0x1b6   : > { %1688 = vmatpush1.bf16.msra.mxu0 %v1783_v10  ;;  %v1006_v10 = vsub.s32 1, %v1001_v7 }
 0x1b7   : > { %1690 = vmatprep.subr.bf16.mxu0 %v1785_v11  ;;  %v1003_v11 = vrot.slane %v665_v9, %v1002_v8 }
 0x1b8   : > { %1788 = vmatpush1.bf16.msra.mxu1 %v1787_v16  ;;  %v1007_v12 = vrot.slane %v665_v9, %v1006_v10 }
 0x1b9   : > { %1790 = vmatprep.subr.bf16.mxu1 %v1789_v17 }
 0x1ba   : > { %1692 = vmatpush1.bf16.msra.mxu0 %v1787_v16 }
 0x1bb   : > { %1224 = vmatmul.mubr.f32.vlgmr.msra.gmra.mrb[4].mxu1 %v2390_v36  ;;  %1694 = vmatprep.subr.bf16.mxu0 %v1789_v17  ;;  %v1801_v36 = vpack.c.bf16 %v1251_v34, %v1249_v33 }
 0x1bc   : > { %1229 = vmatprep.mubr.f32.mxu1 %v2119_v60  ;;  %1792 = vmatpush1.bf16.msra.mxu1 %v2410_v22 }
 0x1bd   : > { %1794 = vmatprep.subr.bf16.mxu1 %v2412_v23 }
 0x1bf   : > { %1230 = vmatmul.mubr.f32.gmra.mrb[6].mxu1 %v2386_v30  ;;  %v1807_v30 = vpack.c.bf16 %v1254_v46, %v1252_v45 }
 0x1c0   : > { %1796 = vmatpush1.bf16.msra.mxu1 %v1795_v28  ;;  %1332 = vmatprep.mubr.f32.mxu1 %v2119_v60 }
 0x1c1   : > { %1798 = vmatprep.subr.bf16.mxu1 %v1797_v29 }
 0x1c4   : > { %1800 = vmatpush1.bf16.msra.mxu1 %v1799_v37 }
 0x1c5   : > { %1802 = vmatprep.subr.bf16.mxu1 %v1801_v36 }
 0x1c8   : > { %1804 = vmatpush1.bf16.msra.mxu1 %v1803_v43 }
 0x1c9   : > { %1806 = vmatprep.subr.bf16.mxu1 %v1805_v44 }
 0x1cc   : > { %1808 = vmatpush1.bf16.msra.mxu1 %v1807_v30 }
 0x1cd   : > { %1810 = vmatprep.subr.bf16.mxu1 %v1809_v49 }
 0x1d0   : > { %1812 = vmatpush1.bf16.msra.mxu1 %v1811_v54 }
 0x1d1   : > { %1814 = vmatprep.subr.bf16.mxu1 %v1813_v55 }
 0x1d4   : > { %1816 = vmatpush1.bf16.msra.mxu1 %v1815_v61 }
 0x1d5   : > { %1818 = vmatprep.subr.bf16.mxu1 %v1817_v62 }
 0x1d8   : > { %1820 = vmatpush1.bf16.msra.mxu1 %v1819_v1 }
 0x24e   : > { %v1588_v2 = vpop.f32.mrb[2].mxu1 }
 0x24f   : > { %v1581_v3 = vpop.f32.mrb[2].mxu0  ;;  %v656_v4 = vpop.f32.mrb[3].mxu1 }
 0x250   : > { %v572_v5 = vpop.f32.mrb[3].mxu0  ;;  %1333 = vmatmul.mubr.f32.vlgmr.msra.gmra.mrb[4].mxu1 %v656_v4 }
 0x251   : > { %873 = vmatmul.mubr.f32.vlgmr.msra.gmra.mrb[4].mxu0 %v572_v5  ;;  %1338 = vmatprep.mubr.f32.mxu1 %v2119_v60 }
 0x252   : > { %1696 = vmatpush1.bf16.msra.mxu0 %v2410_v22  ;;  %878 = vmatprep.mubr.f32.mxu0 %v2119_v60 }
 0x253   : > { %1698 = vmatprep.subr.bf16.mxu0 %v2412_v23 }
 0x254   : > { %1339 = vmatmul.mubr.f32.gmra.mrb[6].mxu1 %v1588_v2 }
 0x255   : > { %879 = vmatmul.mubr.f32.gmra.mrb[6].mxu0 %v1581_v3 }
 0x256   : > { %1700 = vmatpush1.bf16.msra.mxu0 %v1795_v28  ;;  %982 = vmatprep.mubr.f32.mxu0 %v2119_v60 }
 0x257   : > { %1702 = vmatprep.subr.bf16.mxu0 %v1797_v29 }
 0x25a   : > { %1704 = vmatpush1.bf16.msra.mxu0 %v1799_v37 }
 0x25b   : > { %1706 = vmatprep.subr.bf16.mxu0 %v1801_v36 }
 0x25e   : > { %1708 = vmatpush1.bf16.msra.mxu0 %v1803_v43 }
 0x25f   : > { %1710 = vmatprep.subr.bf16.mxu0 %v1805_v44 }
 0x262   : > { %1712 = vmatpush1.bf16.msra.mxu0 %v1807_v30 }
 0x263   : > { %1714 = vmatprep.subr.bf16.mxu0 %v1809_v49 }
 0x266   : > { %1716 = vmatpush1.bf16.msra.mxu0 %v1811_v54 }
 0x267   : > { %1718 = vmatprep.subr.bf16.mxu0 %v1813_v55 }
 0x26a   : > { %1720 = vmatpush1.bf16.msra.mxu0 %v1815_v61 }
 0x26b   : > { %1722 = vmatprep.subr.bf16.mxu0 %v1817_v62 }
 0x26e   : > { %1724 = vmatpush1.bf16.msra.mxu0 %v1819_v1 }
 0x271   : > { %983 = vmatmul.mubr.f32.vlgmr.msra.gmra.mrb[4].mxu0 %v2392_v38 }
 0x272   : > { %988 = vmatprep.mubr.f32.mxu0 %v2119_v60 }
 0x275   : > { %989 = vmatmul.mubr.f32.gmra.mrb[6].mxu0 %v2388_v35 }
 0x323   : > { %v1334_v13 = vpop.f32.mrb[4].mxu1 }
 0x324   : > { %v1349_v14 = vadd.f32 %v1334_v13, %v1003_v11  ;;  %v1336_v15 = vpop.f32.mrb[5].mxu1 }
 0x325   : > { %v1350_v38 = vadd.f32 %v1336_v15, %v1007_v12 }
 0x326   : > { %1498 = vst [vmem:[%s313_s10 + $0x20] sm:$0xff] %v1349_v14 }
 0x327   : > { %1499 = vst [vmem:[%s313_s10 + $0x28] sm:$0xff] %v1350_v38  ;;  %v1340_v35 = vpop.f32.mrb[6].mxu1 }
 0x328   : > { %v1351_v60 = vadd.f32 %v1340_v35, %v1003_v11  ;;  %v1342_v16 = vpop.f32.mrb[7].mxu1 }
 0x329   : > { %v1352_v17 = vadd.f32 %v1342_v16, %v1007_v12 }
 0x32a   : > { %1500 = vst [vmem:[%s313_s10 + $0x30] sm:$0xff] %v1351_v60 }
 0x32b   : > { %1501 = vst [vmem:[%s313_s10 + $0x38] sm:$0xff] %v1352_v17 }
 0x344   : > { %v984_v18 = vpop.f32.mrb[4].mxu0 }
 0x345   : > { %v1010_v19 = vadd.f32 %v1003_v11, %v984_v18  ;;  %v986_v20 = vpop.f32.mrb[5].mxu0 }
 0x346   : > { %v1011_v21 = vadd.f32 %v1007_v12, %v986_v20 }
 0x347   : > { %1014 = vst [vmem:[%s313_s10] sm:$0xff] %v1010_v19 }
 0x348   : > { %1015 = vst [vmem:[%s313_s10 + $0x8] sm:$0xff] %v1011_v21  ;;  %v990_v22 = vpop.f32.mrb[6].mxu0 }
 0x349   : > { %v1012_v23 = vadd.f32 %v1003_v11, %v990_v22  ;;  %v992_v24 = vpop.f32.mrb[7].mxu0 }
 0x34a   : > { %v1013_v25 = vadd.f32 %v1007_v12, %v992_v24 }
 0x34b   : > { %1016 = vst [vmem:[%s313_s10 + $0x10] sm:$0xff] %v1012_v23 }
 0x34c   : > { %1017 = vst [vmem:[%s313_s10 + $0x18] sm:$0xff] %v1013_v25 }
 0x34d   : > { %2048 = shalt.err (!%p2045_p4)
}
 0x34e   : > { %s2049_s27 = scalar_lea.hbm %s2438_s8, 1024  ;;  %s2053_s19 = scalar_lea.hbm %s2488_s6, 2048 }
 0x34f   : > { %p2050_p9 = scmp.ne.s32.totalorder %s2438_s8, %s2049_s27  ;;  %p2054_p8 = scmp.lt.u32.totalorder %s2438_s8, %s2488_s6 }
 0x350   : > { %p2055_p13 = scmp.lt.u32.totalorder %s2053_s19, %s2049_s27  ;;  %p2057_p10 = scmp.lt.u32.totalorder %s2049_s27, %s2438_s8 }
 0x351   : > { %p2051_p0 = pnand %p2050_p9, %p2306_p5 }
 0x352   : > { %p2056_p6 = por %p2055_p13, %p2054_p8 }
 0x353   : > { %p2052_p11 = pneg %p2051_p0 }
 0x354   : > { %p2058_p3 = por %p2057_p10, %p2056_p6 }
 0x356   : > { %p2059_p7 = pnand %p2058_p3, %p2052_p11 }
 0x358   : > { %2062 = shalt.err (!%p2059_p7)
}
 0x359   : > { %s2121_s26 = smov 256   ;;  %s2122_s11 = smov 16  }
 0x35a   : > { %1851 = dma.vmem_to_hbm [thread:$0]  (%p2306_p5), %s2433_s1, 1024, %s2438_s8, %s1359_s12, %s2121_s26, %s2121_s26, %s2122_s11  }
 0x35b PF: > { %s1387_s7 = sand.u32 1, %s2097_s21   ;;  %p2514_p12 = scmp.ne.s32.totalorder %s2498_s28, 0 }
 0x35c   : > { %p2515_p1 = scmp.ge.s32.totalorder %s2109_s24, 2  ;;  %s1388_s25 = scalar_lea.sflag [#allocation4], %s1387_s7 }
 0x35e   : > { %p1868_p2 = pnand %p2515_p1, %p2514_p12 }
 0x360   : > { %2092 = dma.done.wait (!%p1868_p2), %s1388_s25, 1024  }
 0x361   : > { %2094 = vsyncadd (!%p1868_p2), %s1388_s25, 4294966272  ;;  %p21_p4 = scmp.ge.s32.totalorder %s2271_s14, 4   ;;  %s2516_s21 = smov %s2101_s22 }
 0x362   : > { %s2517_s22 = smov %s2105_s23  ;;  %s2518_s23 = smov %s2302_s30 }
 0x363   : > { %s2519_s24 = smov %s2271_s14  ;;  %23 = sbr.rel (!%p21_p4) target bundleno = 9 (0x9), region = 106 }
 0x36a   :  { %1393 = vsyncpa [#allocation3], 1 }
 0x36b   :  { %1395 = vsyncpa [#allocation3 + $0x1], 1 }
 0x36c   :  { %1396 = vsyncpa [#allocation6], 1 }
 0x36d   :  { %1397 = vsyncpa [#allocation9], 1 }
 0x36e   :  { %1398 = vsyncpa [#allocation4], 1 }
 0x36f   :  { %1400 = vsyncpa [#allocation4 + $0x1], 1 }

</bundles_post_ra>
